<compile_context>
chip_gen: v7x
topology: tpu7x:2x2x1
jax: 0.10.0
libtpu: 0.0.40
codegen_flags: <defaults>
</compile_context>

<pallas_src>
import functools

import jax
import jax.numpy as jnp
from jax.experimental import pallas as pl
from jax.experimental.pallas import tpu as pltpu


def _label_smoothing_kernel(pred_ref, tgt_ref, loss_ref, loss_acc, *,
                            smoothing, confidence, ignore_index,
                            n_rows, tiles_per_split):
    p = pl.program_id(0)          # row-range split (parallel; 2 TCs on v7x)
    i = pl.program_id(1)          # tile index inside this split (reduction)

    @pl.when(i == 0)
    def _():
        loss_acc[...] = jnp.zeros_like(loss_acc)

    x_in = pred_ref[...]                              # (TN, C), input dtype
    tgt = tgt_ref[...]                                # (TN, 1) int32
    tn, c = x_in.shape

    # Row validity: ragged last tile and clamped duplicate tiles are killed by
    # the global row-index check; padding tokens by ignore_index.  Garbage rows
    # may produce NaN/inf -- jnp.where *selects*, so they never reach the sum.
    tile_idx = p * tiles_per_split + i
    row0 = tile_idx * tn
    rows = row0 + jax.lax.broadcasted_iota(jnp.int32, (tn, 1), 0)
    valid = jnp.logical_and(rows < n_rows, tgt != ignore_index)   # (TN,1) bool

    # log_softmax pieces; full logp / weights tensors are never materialized in
    # HBM and only one weighted lane reduction is needed besides max and lse.
    m = jnp.max(x_in, axis=-1, keepdims=True).astype(jnp.float32)  # exact
    z = x_in.astype(jnp.float32) - m                               # (TN, C) f32
    lse = jnp.log(jnp.sum(jnp.exp(z), axis=-1, keepdims=True))     # (TN, 1)

    smooth_w = smoothing / (c - 1)
    col = jax.lax.broadcasted_iota(jnp.int32, (1, c), 1)           # (1, C)
    w = jnp.where(col == tgt, confidence, smooth_w)                # (TN, C) f32
    wz = jnp.sum(w * z, axis=-1, keepdims=True)                    # (TN, 1)

    # weights sum to 1  =>  row_loss = -sum_c w_c*(z_c - lse) = lse - sum_c w_c*z_c
    row_loss = lse - wz

    loss_acc[...] += jnp.where(valid, row_loss, 0.0)

    @pl.when(i == pl.num_programs(1) - 1)
    def _():
        loss_ref[...] = jnp.broadcast_to(jnp.sum(loss_acc[...]), (1, 1, 1))


def _round_up(x, m):
    return ((x + m - 1) // m) * m


def _tpu_config():
    """Best-effort chip introspection; conservative defaults if unavailable."""
    vmem_bytes = 128 * 1024 * 1024
    n_cores = 1
    try:
        info = pltpu.get_tpu_info()
        for attr in ("vmem_capacity_bytes", "vmem_bytes", "vmem_size_bytes"):
            v = getattr(info, attr, None)
            if isinstance(v, int) and v > 0:
                vmem_bytes = v
                break
        for attr in ("num_cores", "tensorcore_count", "num_tensorcores",
                     "cores_per_chip", "core_count"):
            v = getattr(info, attr, None)
            if isinstance(v, int) and v > 0:
                n_cores = v
                break
    except Exception:
        pass
    return vmem_bytes, n_cores


def label_smoothing_loss(pred, target, *, smoothing=0.1, ignore_index=-100,
                         reduction="mean", row_tile=None, num_splits=None,
                         target_block_bytes=None, vmem_limit_bytes=None):
    """pred: (N, C) float (f32 or bf16); target: (N,) int.  'mean' only."""
    assert reduction == "mean"  # TODO(synk): 'sum'/'none' return tensors of
    #                             data-dependent size in PyTorch (boolean-mask
    #                             indexing); only 'mean' is implemented in-kernel.
    confidence = 1.0 - smoothing
    n, c = pred.shape

    # ---- generation-aware defaults -------------------------------------
    vmem_bytes, n_cores = _tpu_config()
    small_vmem = vmem_bytes <= 64 * 1024 * 1024          # v7x: 64 MiB per TC
    if target_block_bytes is None:
        target_block_bytes = (2 if small_vmem else 4) * 1024 * 1024
    if vmem_limit_bytes is None:
        vmem_limit_bytes = (32 if small_vmem else 48) * 1024 * 1024
    if num_splits is None:
        # Only v7x's two TensorCores benefit from the parallel leading axis;
        # on single-TC v5e/v6e a split is a serial loop plus a possible
        # duplicated (clamped) tile DMA, so default to 1 there.
        num_splits = 2 if (small_vmem or n_cores >= 2) else 1

    # ---- tile sizing ----------------------------------------------------
    itemsize = jnp.dtype(pred.dtype).itemsize
    if row_tile is None:
        # HBM block budget uses the actual input dtype (bf16 gets 2x the rows
        # per DMA block) ...
        rt_hbm = target_block_bytes // (c * itemsize)
        # ... while the in-kernel f32 working set (z / exp(z) / w temporaries)
        # is capped independently so Mosaic never nears the VMEM limit.
        f32_tile_budget = (2 if small_vmem else 6) * 1024 * 1024
        rt_f32 = f32_tile_budget // (c * 4)
        row_tile = min(rt_hbm, rt_f32)
        row_tile = max(8, min(2048, (row_tile // 8) * 8))
    row_tile = max(8, (row_tile // 8) * 8)
    row_tile = min(row_tile, _round_up(n, 8))

    tiles_total = pl.cdiv(n, row_tile)
    num_splits = max(1, min(num_splits, tiles_total))
    tiles_per_split = pl.cdiv(tiles_total, num_splits)

    # Clamp out-of-range tile indices to the last real tile; those duplicated
    # rows are masked out in-kernel, so pred is never copied/padded in HBM.
    def _tile_map(p_, i_):
        return (jnp.minimum(p_ * tiles_per_split + i_, tiles_total - 1), 0)

    target2d = target.reshape(n, 1).astype(jnp.int32)

    kernel = functools.partial(
        _label_smoothing_kernel,
        smoothing=float(smoothing),
        confidence=float(confidence),
        ignore_index=int(ignore_index),
        n_rows=n,
        tiles_per_split=tiles_per_split,
    )

    loss_parts = pl.pallas_call(
        kernel,
        out_shape=jax.ShapeDtypeStruct((num_splits, 1, 1), jnp.float32),
        grid_spec=pltpu.PrefetchScalarGridSpec(
            num_scalar_prefetch=0,
            grid=(num_splits, tiles_per_split),
            in_specs=[
                pl.BlockSpec((row_tile, c), _tile_map),
                pl.BlockSpec((row_tile, 1), _tile_map),
            ],
            out_specs=pl.BlockSpec((1, 1, 1), lambda p_, i_: (p_, 0, 0)),
            scratch_shapes=[
                pltpu.VMEM((row_tile, 1), jnp.float32),
            ],
        ),
        compiler_params=pltpu.CompilerParams(
            dimension_semantics=("parallel", "arbitrary"),
            vmem_limit_bytes=vmem_limit_bytes,
        ),
    )(pred, target2d)

    # Valid-row count computed on the tiny target vector in plain JAX (free);
    # removes the second accumulator / output from the kernel entirely.
    cnt = jnp.sum((target != ignore_index).astype(jnp.float32))

    # Final scalar glue: combine per-split partials.
    # Note: if every row is ignored this is 0/0 -> NaN, same as PyTorch.
    return jnp.sum(loss_parts) / cnt


def _reference(pred, target, *, smoothing=0.1, ignore_index=-100):
    """Pure-JAX reference mirroring the PyTorch module ('mean' reduction)."""
    c = pred.shape[-1]
    logp = jax.nn.log_softmax(pred.astype(jnp.float32), axis=-1)
    keep = (target != ignore_index).astype(jnp.float32)
    smooth_w = smoothing / (c - 1)
    onehot = jax.nn.one_hot(target, c, dtype=jnp.float32)
    w = smooth_w + (1.0 - smoothing - smooth_w) * onehot
    row_loss = -jnp.sum(w * logp, axis=-1)
    return jnp.sum(row_loss * keep) / jnp.sum(keep)


if __name__ == "__main__":
    key = jax.random.PRNGKey(0)
    k1, k2, k3, k4, k5, k6 = jax.random.split(key, 6)

    # Test 1: small shapes matching the module's usage (tokens x label classes).
    N, C = 14, 32
    pred = jax.random.normal(k1, (N, C), dtype=jnp.float32)
    target = jax.random.randint(k2, (N,), 0, C, dtype=jnp.int32)
    target = target.at[3].set(-100).at[10].set(-100)      # padding tokens

    out = label_smoothing_loss(pred, target, smoothing=0.1, ignore_index=-100)
    out = jax.block_until_ready(out)
    ref = _reference(pred, target, smoothing=0.1, ignore_index=-100)
    assert jnp.allclose(out, ref, rtol=1e-5, atol=1e-5), (out, ref)

    # Test 2: multi-tile, ragged row count + explicit 2-way split path
    # (exercises the clamped duplicate tile + masking).
    N2, C2 = 300, 96
    pred2 = jax.random.normal(k3, (N2, C2), dtype=jnp.float32)
    target2 = jax.random.randint(k4, (N2,), 0, C2, dtype=jnp.int32)
    target2 = target2.at[0].set(-100).at[157].set(-100).at[299].set(-100)

    out2 = label_smoothing_loss(pred2, target2, smoothing=0.1,
                                ignore_index=-100, row_tile=64, num_splits=2)
    out2 = jax.block_until_ready(out2)
    ref2 = _reference(pred2, target2, smoothing=0.1, ignore_index=-100)
    assert jnp.allclose(out2, ref2, rtol=1e-5, atol=1e-5), (out2, ref2)

    # Test 3: bf16 input, ragged N (regression guard for the select-masking of
    # garbage boundary rows and the bf16 row-max fast path).
    N3, C3 = 70, 48
    pred3 = jax.random.normal(k5, (N3, C3), dtype=jnp.float32).astype(jnp.bfloat16)
    target3 = jax.random.randint(k6, (N3,), 0, C3, dtype=jnp.int32)
    target3 = target3.at[5].set(-100).at[69].set(-100)

    out3 = label_smoothing_loss(pred3, target3, smoothing=0.1,
                                ignore_index=-100, row_tile=32)
    out3 = jax.block_until_ready(out3)
    ref3 = _reference(pred3, target3, smoothing=0.1, ignore_index=-100)
    assert jnp.allclose(out3, ref3, rtol=1e-4, atol=1e-4), (out3, ref3)

    print("KERNEL_OK")
</pallas_src>

<mosaic_0001>
module attributes {stable_mosaic.version = 11 : i64} {
  func.func @_label_smoothing_kernel(%arg0: i32, %arg1: i32, %arg2: memref<16x32xf32, #tpu.memory_space<vmem>>, %arg3: memref<16x1xi32, #tpu.memory_space<vmem>>, %arg4: memref<1x1x1xf32, #tpu.memory_space<vmem>>, %arg5: memref<16x1xf32, #tpu.memory_space<vmem>>) attributes {dimension_semantics = [#tpu.dimension_semantics<parallel>, #tpu.dimension_semantics<arbitrary>], iteration_bounds = array<i64: 1, 1>, scalar_prefetch = 0 : i64, scratch_operands = 1 : i64, tpu.core_type = #tpu.core_type<tc>, window_params = [{transform_indices = @transform_0, window_bounds = array<i64: 16, 32>}, {transform_indices = @transform_1, window_bounds = array<i64: 16, 1>}, {transform_indices = @transform_2, window_bounds = array<i64: 1, 1, 1>}]} {
    %c0_i32 = arith.constant 0 : i32
    %0 = arith.cmpi eq, %arg1, %c0_i32 : i32
    %1 = arith.extui %0 : i1 to i32
    %c0_i32_0 = arith.constant 0 : i32
    %2 = arith.cmpi ne, %1, %c0_i32_0 : i32
    scf.if %2 {
      %cst_15 = arith.constant 0.000000e+00 : f32
      %43 = vector.broadcast %cst_15 : f32 to vector<16x1xf32>
      %c0_16 = arith.constant 0 : index
      %c0_17 = arith.constant 0 : index
      %44 = vector.load %arg5[%c0_16, %c0_17] : memref<16x1xf32, #tpu.memory_space<vmem>>, vector<16x1xf32>
      tpu.vector_store %arg5[%c0_16, %c0_17], %43 {strides = array<i32>} : memref<16x1xf32, #tpu.memory_space<vmem>>, vector<16x1xf32>,
    } else {
    }
    %c0 = arith.constant 0 : index
    %c0_1 = arith.constant 0 : index
    %3 = vector.load %arg2[%c0, %c0_1] : memref<16x32xf32, #tpu.memory_space<vmem>>, vector<16x32xf32>
    %c0_2 = arith.constant 0 : index
    %c0_3 = arith.constant 0 : index
    %4 = vector.load %arg3[%c0_2, %c0_3] : memref<16x1xi32, #tpu.memory_space<vmem>>, vector<16x1xi32>
    %c1_i32 = arith.constant 1 : i32
    %5 = arith.muli %arg0, %c1_i32 : i32
    %6 = arith.addi %5, %arg1 : i32
    %c16_i32 = arith.constant 16 : i32
    %7 = arith.muli %6, %c16_i32 : i32
    %8 = tpu.iota {dimensions = array<i32: 0>} : vector<16x1xi32>
    %9 = vector.broadcast %7 : i32 to vector<16x1xi32>
    %10 = arith.addi %9, %8 : vector<16x1xi32>
    %c14_i32 = arith.constant 14 : i32
    %11 = vector.broadcast %c14_i32 : i32 to vector<16x1xi32>
    %12 = arith.cmpi slt, %10, %11 : vector<16x1xi32>
    %c-100_i32 = arith.constant -100 : i32
    %13 = vector.broadcast %c-100_i32 : i32 to vector<16x1xi32>
    %14 = arith.cmpi ne, %4, %13 : vector<16x1xi32>
    %15 = arith.andi %12, %14 : vector<16x1xi1>
    %cst = arith.constant dense<0xFF800000> : vector<16xf32>
    %16 = vector.multi_reduction <maximumf>, %3, %cst [1] : vector<16x32xf32> to vector<16xf32>
    %17 = vector.shape_cast %16 : vector<16xf32> to vector<16x1xf32>
    %18 = vector.broadcast %17 : vector<16x1xf32> to vector<16x32xf32>
    %19 = arith.subf %3, %18 : vector<16x32xf32>
    %20 = math.exp %19 : vector<16x32xf32>
    %cst_4 = arith.constant dense<0.000000e+00> : vector<16xf32>
    %21 = vector.multi_reduction <add>, %20, %cst_4 [1] : vector<16x32xf32> to vector<16xf32>
    %22 = vector.shape_cast %21 : vector<16xf32> to vector<16x1xf32>
    %23 = math.log %22 : vector<16x1xf32>
    %24 = tpu.iota {dimensions = array<i32: 1>} : vector<1x32xi32>
    %25 = vector.broadcast %24 : vector<1x32xi32> to vector<16x32xi32>
    %26 = vector.broadcast %4 : vector<16x1xi32> to vector<16x32xi32>
    %27 = arith.cmpi eq, %25, %26 : vector<16x32xi32>
    %cst_5 = arith.constant 0.899999976 : f32
    %cst_6 = arith.constant 0.0032258064 : f32
    %28 = vector.broadcast %cst_5 : f32 to vector<16x32xf32>
    %29 = vector.broadcast %cst_6 : f32 to vector<16x32xf32>
    %30 = arith.select %27, %28, %29 : vector<16x32xi1>, vector<16x32xf32>
    %31 = arith.mulf %30, %19 : vector<16x32xf32>
    %cst_7 = arith.constant dense<0.000000e+00> : vector<16xf32>
    %32 = vector.multi_reduction <add>, %31, %cst_7 [1] : vector<16x32xf32> to vector<16xf32>
    %33 = vector.shape_cast %32 : vector<16xf32> to vector<16x1xf32>
    %34 = arith.subf %23, %33 : vector<16x1xf32>
    %c0_8 = arith.constant 0 : index
    %c0_9 = arith.constant 0 : index
    %35 = vector.load %arg5[%c0_8, %c0_9] : memref<16x1xf32, #tpu.memory_space<vmem>>, vector<16x1xf32>
    %cst_10 = arith.constant 0.000000e+00 : f32
    %36 = vector.broadcast %cst_10 : f32 to vector<16x1xf32>
    %37 = arith.select %15, %34, %36 : vector<16x1xi1>, vector<16x1xf32>
    %38 = arith.addf %35, %37 : vector<16x1xf32>
    %c0_11 = arith.constant 0 : index
    %c0_12 = arith.constant 0 : index
    %39 = vector.load %arg5[%c0_11, %c0_12] : memref<16x1xf32, #tpu.memory_space<vmem>>, vector<16x1xf32>
    tpu.vector_store %arg5[%c0_11, %c0_12], %38 {strides = array<i32>} : memref<16x1xf32, #tpu.memory_space<vmem>>, vector<16x1xf32>,
    %c0_i32_13 = arith.constant 0 : i32
    %40 = arith.cmpi eq, %arg1, %c0_i32_13 : i32
    %41 = arith.extui %40 : i1 to i32
    %c0_i32_14 = arith.constant 0 : i32
    %42 = arith.cmpi ne, %41, %c0_i32_14 : i32
    scf.if %42 {
      %c0_15 = arith.constant 0 : index
      %c0_16 = arith.constant 0 : index
      %43 = vector.load %arg5[%c0_15, %c0_16] : memref<16x1xf32, #tpu.memory_space<vmem>>, vector<16x1xf32>
      %44 = vector.shape_cast %43 : vector<16x1xf32> to vector<1x16x1xf32>
      %cst_17 = arith.constant dense<0.000000e+00> : vector<1xf32>
      %45 = vector.multi_reduction <add>, %44, %cst_17 [1, 2] : vector<1x16x1xf32> to vector<1xf32>
      %46 = vector.shape_cast %45 : vector<1xf32> to vector<1x1x1xf32>
      %47 = vector.extract %46[0, 0, 0] : f32 from vector<1x1x1xf32>
      %48 = vector.broadcast %47 : f32 to vector<1x1x1xf32>
      %c0_18 = arith.constant 0 : index
      %c0_19 = arith.constant 0 : index
      %c0_20 = arith.constant 0 : index
      %49 = vector.load %arg4[%c0_18, %c0_19, %c0_20] : memref<1x1x1xf32, #tpu.memory_space<vmem>>, vector<1x1x1xf32>
      tpu.vector_store %arg4[%c0_18, %c0_19, %c0_20], %48 {strides = array<i32>} : memref<1x1x1xf32, #tpu.memory_space<vmem>>, vector<1x1x1xf32>,
    } else {
    }
    return
  }
  func.func @transform_0(%arg0: i32, %arg1: i32) -> (i32, i32) {
    %c1_i32 = arith.constant 1 : i32
    %0 = arith.muli %arg0, %c1_i32 : i32
    %1 = arith.addi %0, %arg1 : i32
    %c0_i32 = arith.constant 0 : i32
    %2 = arith.minsi %1, %c0_i32 : i32
    %c0_i32_0 = arith.constant 0 : i32
    %c0_i32_1 = arith.constant 0 : i32
    return %2, %c0_i32_0 : i32, i32
  }
  func.func @transform_1(%arg0: i32, %arg1: i32) -> (i32, i32) {
    %c1_i32 = arith.constant 1 : i32
    %0 = arith.muli %arg0, %c1_i32 : i32
    %1 = arith.addi %0, %arg1 : i32
    %c0_i32 = arith.constant 0 : i32
    %2 = arith.minsi %1, %c0_i32 : i32
    %c0_i32_0 = arith.constant 0 : i32
    %c0_i32_1 = arith.constant 0 : i32
    return %2, %c0_i32_0 : i32, i32
  }
  func.func @transform_2(%arg0: i32, %arg1: i32) -> (i32, i32, i32) {
    %c0_i32 = arith.constant 0 : i32
    %c0_i32_0 = arith.constant 0 : i32
    %c0_i32_1 = arith.constant 0 : i32
    return %arg0, %c0_i32, %c0_i32_0 : i32, i32, i32
  }
}

</mosaic_0001>

<bundles_post_ra>
// kernel: tpu_custom_call.1
= control target key start
LH: loop header
LB: loop body
LE: loop exit
PB: predicated region body
PF: predicated region fallthrough
CT: control target
= control target key end

     0   :  { %vm101_vm0 = vcmask 261120   ;;  %v241_v4 = vmov 0   ;;  %s296_s0 = inlined_call_operand.vmem [shape: f32[14,32], index: 0, kind: input, shape index: {}]   ;;  %s297_s1 = inlined_call_operand.vmem [shape: s32[14,1], index: 1, kind: input, shape index: {}]   ;;  %s298_s2 = inlined_call_operand.hbm [shape: f32[1,1,1], index: 2, kind: output, shape index: {}]  }
   0x1   :  { %v83_v0 = vld [vmem:[%s296_s0] sm:$0xff]  ;;  %v84_v1 = vld [vmem:[%s296_s0 + $0x8] sm:$0xff]  ;;  %207 = vset.pattern.permute.xlu1 %v241_v4  ;;  %208 = vset.pattern.permute.xlu0 %v241_v4 }
   0x2   :  { %v85_v2 = vld [vmem:[%s297_s1] sm:$0xff]  ;;  %v102_v3 = vsel %vm101_vm0, %v83_v0, -inf }
   0x3   :  { %103 = vmax.xlane.f32.xlu0 %v102_v3  ;;  %127 = vperm.xlu1 %207, %v85_v2  }
   0x4   :  { %7 = vsyncpa [#allocation4], 0  ;;  %v105_v5 = vsel %vm101_vm0, %v84_v1, -inf  ;;  %v86_v6 = vld [vmem:[%s297_s1 + $0x8] sm:$0xff]  ;;  %v89_v9 = vlaneseq  ;;  %v242_v17 = vmov 0.0032258064  }
   0x5   :  { %vm80_vm3 = vcmask 7168   ;;  %v243_v28 = vmov 0.0   ;;  %vm97_vm4 = vcmp.ne.s32.totalorder %v85_v2, 4294967196  ;;  %vm98_vm5 = vcmp.ne.s32.totalorder %v86_v6, 4294967196  ;;  %s244_s0 = smov [#allocation3]  }
   0x6   :  { %v125_v14 = vand.u32 127, %v89_v9  ;;  %81 = vst.msk [vmem:[#allocation2] sm:$0xff] %vm80_vm3, %v243_v28  ;;  %82 = vst.msk [vmem:[#allocation2 + $0x8] sm:$0xff] %vm80_vm3, %v243_v28  ;;  %v90_v31 = vshrl.u32 %v89_v9, 7  ;;  %s181_s1 = sshll.u32 %s244_s0, 4  ;;  %vm173_vm8 = vcmask 0   ;;  %s182_s1 = int_to_ptr.vmem [resolvable:$true] %s181_s1 }
   0x7   :  { %106 = vmax.xlane.f32.xlu0 %v105_v5  ;;  %130 = vperm.xlu1 %207, %v86_v6   ;;  %s217_s18 = scalar_lea.vmem %s182_s1, 16  ;;  %s221_s19 = scalar_lea.vmem %s182_s1, 32 }
   0x8   :  { %v91_v32 = vadd.s32 8, %v90_v31  ;;  %p218_p0 = scmp.ne.s32.totalorder %s182_s1, %s217_s18  ;;  %p222_p1 = scmp.lt.s32.totalorder %s182_s1, %s182_s1 }
   0x9   :  { %p223_p2 = scmp.lt.s32.totalorder %s221_s19, %s217_s18 }
   0xa   :  { %vm96_vm6 = vcmp.lt.s32.totalorder %v91_v32, 14 }
   0xb   :  { %vm100_vm7 = vmand %vm96_vm6, %vm98_vm5  ;;  %p224_p3 = por %p223_p2, %p222_p1 }
   0xd   :  { %v146_v37 = vld [vmem:[#allocation2] sm:$0xff]  ;;  %v147_v44 = vld [vmem:[#allocation2 + $0x8] sm:$0xff]  ;;  %p225_p4 = pnand %p224_p3, %p218_p0 }
  0x82   :  { %v128_v12 = vpop.permute.xlu1 %127 }
  0x83   :  { %vm132_vm1 = vcmp.eq.s32.totalorder %v125_v14, %v128_v12 }
  0x84   :  { %v134_v18 = vsel %vm132_vm1, 0.9, %v242_v17 }
  0x86   :  { %v131_v16 = vpop.permute.xlu1 %130 }
  0x87   :  { %vm133_vm2 = vcmp.eq.s32.totalorder %v125_v14, %v131_v16 }
  0x88   :  { %v135_v22 = vsel %vm133_vm2, 0.9, %v242_v17 }
  0x90   :  { %v104_v7 = vpop.xlane.xlu0 %103 }
  0x91   :  { %v108_v8 = vsub.f32 %v83_v0, %v104_v7 }
  0x93   :  { %v110_v10 = vmul.f32 1.442695, %v108_v8  ;;  %v136_v21 = vmul.f32 %v134_v18, %v108_v8 }
  0x94   :  { %v107_v11 = vpop.xlane.xlu0 %106 }
  0x95   :  { %209 = vpow2.f32 %v110_v10  ;;  %v109_v13 = vsub.f32 %v84_v1, %v107_v11  ;;  %v138_v24 = vsel %vm101_vm0, %v136_v21, 0.0 }
  0x97   :  { %v112_v15 = vmul.f32 1.442695, %v109_v13  ;;  %v137_v26 = vmul.f32 %v135_v22, %v109_v13 }
  0x99   :  { %211 = vpow2.f32 %v112_v15  ;;  %v141_v27 = vsel %vm101_vm0, %v137_v26, 0.0 }
  0x9f   :  { %v210_v19 = vpop.eup %209 }
  0xa0   :  { %v114_v20 = vsel %vm101_vm0, %v210_v19, 0.0 }
  0xa1   :  { %115 = vadd.xlane.f32.xlu0 %v114_v20 }
  0xa3   :  { %v212_v23 = vpop.eup %211 }
  0xa4   :  { %v117_v25 = vsel %vm101_vm0, %v212_v23, 0.0 }
  0xa5   :  { %139 = vadd.xlane.f32.xlu0 %v138_v24  ;;  %118 = vadd.xlane.f32.xlu1 %v117_v25 }
  0xa9   :  { %142 = vadd.xlane.f32.xlu0 %v141_v27 }
 0x12e   :  { %v116_v29 = vpop.xlane.xlu0 %115 }
 0x12f   :  { %213 = vlog2.f32 %v116_v29 }
 0x132   :  { %v119_v30 = vpop.xlane.xlu1 %118  ;;  %v140_v34 = vpop.xlane.xlu0 %139 }
 0x133   :  { %215 = vlog2.f32 %v119_v30 }
 0x136   :  { %v143_v42 = vpop.xlane.xlu0 %142 }
 0x139   :  { %v214_v33 = vpop.eup %213 }
 0x13a   :  { %v121_v35 = vmul.f32 0.6931472, %v214_v33 }
 0x13c   :  { %v144_v36 = vsub.f32 %v121_v35, %v140_v34 }
 0x13d   :  { %v216_v38 = vpop.eup %215 }
 0x13e   :  { %v148_v39 = vsel %vm97_vm4, %v144_v36, 0.0  ;;  %v123_v40 = vmul.f32 0.6931472, %v216_v38 }
 0x13f   :  { %v150_v41 = vadd.f32 %v148_v39, %v146_v37 }
 0x140   :  { %v145_v43 = vsub.f32 %v123_v40, %v143_v42 }
 0x141   :  { %153 = vst.msk [vmem:[#allocation2] sm:$0xff] %vm80_vm3, %v150_v41 }
 0x142   :  { %v149_v45 = vsel %vm100_vm7, %v145_v43, 0.0 }
 0x143   :  { %v151_v46 = vadd.f32 %v149_v45, %v147_v44 }
 0x145   :  { %154 = vst.msk [vmem:[#allocation2 + $0x8] sm:$0xff] %vm80_vm3, %v151_v46 }
 0x148   :  { %v158_v47 = vld [vmem:[#allocation2] sm:$0xff] }
 0x149   :  { %v160_v49 = vsel %vm80_vm3, %v158_v47, 0.0 }
 0x14c   :  { %v159_v48 = vld [vmem:[#allocation2 + $0x8] sm:$0xff] }
 0x14d   :  { %v161_v50 = vsel %vm80_vm3, %v159_v48, 0.0 }
 0x14e   :  { %v162_v51 = vadd.f32 %v161_v50, %v160_v49 }
 0x150   :  { %163 = vadd.xlane.f32.xlu0 %v162_v51 }
 0x1dd   :  { %v164_v52 = vpop.xlane.xlu0 %163 }
 0x1de   :  { %v165_v53 = vrot.slane %v164_v52, 4 }
 0x1e0   :  { %v166_v54 = vadd.f32 %v165_v53, %v164_v52 }
 0x1e2   :  { %v167_v55 = vrot.slane %v166_v54, 2 }
 0x1e4   :  { %v168_v56 = vadd.f32 %v167_v55, %v166_v54 }
 0x1e6   :  { %v169_v57 = vrot.slane %v168_v56, 1 }
 0x1e8   :  { %v170_v58 = vadd.f32 %v169_v57, %v168_v56 }
 0x1ea   :  { %201 = vpush %v170_v58 }
 0x21b   :  { %s202_s17 = spop %201 }
 0x21c   :  { %v172_v59 = vstv %s202_s17 }
 0x21d   :  { %174 = vst.msk [vmem:[#allocation3] sm:$0x1] %vm173_vm8, %v172_v59 }
 0x21e   :  { %228 = shalt.err (!%p225_p4)
}
 0x21f   :  { %s229_s22 = scalar_lea.hbm %s298_s2, 16 }
 0x220   :  { %p230_p5 = scmp.ne.s32.totalorder %s298_s2, %s229_s22  ;;  %p233_p6 = scmp.lt.u32.totalorder %s229_s22, %s298_s2 }
 0x222   :  { %p235_p7 = pnand %p233_p6, %p230_p5 }
 0x224   :  { %238 = shalt.err (!%p235_p7)
}
 0x225   :  { %184 = dma.vmem_to_hbm [thread:$0]  %s182_s1, 16, %s298_s2, [#allocation4]  }
 0x226   :  { %239 = dma.done.wait [#allocation4], 16  }
 0x227   :  { %240 = vsyncadd [#allocation4], 4294967280 }
 0x228   :  { %188 = vsyncpa [#allocation4], 1 }

</bundles_post_ra>
